<compile_context>
chip_gen: v6e
topology: v6e:2x2x1
jax: 0.10.0
libtpu: 0.0.40
codegen_flags: <defaults>
</compile_context>

<pallas_src>
import jax
import jax.numpy as jnp
from jax.experimental import pallas as pl
from jax.experimental.pallas import tpu as pltpu

_LANE = 128
_MAX_DMA_CHUNKS = 8   # concurrent DMAs issued by the kernel
_ROW_ALIGN = 8        # keep chunk boundaries on sublane multiples when possible


def _factorize_2d(total, last_dim):
    """Pick (M, N) with M * N == total for the flat copy view.

    Prefer a lane-dense N (multiple of 128) while keeping M large enough to
    split into several concurrent DMA chunks; fall back to the natural
    trailing dim, then to a single flat row.  The copy is byte-identical for
    any row-major factorization, so this only affects performance.
    """
    candidates = [n for n in (1024, 512, 256, _LANE) if total % n == 0]
    # Largest lane-dense N that still leaves >= _MAX_DMA_CHUNKS rows.
    for n in candidates:
        if total // n >= _MAX_DMA_CHUNKS:
            return total // n, n
    if candidates:
        n = candidates[-1]          # smallest lane-dense divisor -> largest M
        return total // n, n
    n = max(1, last_dim)
    if total % n == 0:
        return total // n, n
    return 1, total


def _chunk_plan(num_rows, max_chunks=_MAX_DMA_CHUNKS, align=_ROW_ALIGN):
    """Static (start, size) row ranges covering [0, num_rows) in <= max_chunks pieces."""
    if num_rows <= align or max_chunks <= 1:
        return [(0, num_rows)]
    chunk = -(-num_rows // max_chunks)          # ceil divide
    chunk = -(-chunk // align) * align          # round up to sublane multiple
    plan, start = [], 0
    while start < num_rows:
        size = min(chunk, num_rows - start)
        plan.append((start, size))
        start += size
    return plan


def _make_dma_copy_kernel(plan):
    """Kernel: issue one HBM->HBM DMA per chunk, then wait on all of them."""

    def kernel(x_hbm, o_hbm, sems):
        copies = []
        for idx, (start, size) in enumerate(plan):
            cp = pltpu.make_async_copy(
                x_hbm.at[pl.ds(start, size), :],
                o_hbm.at[pl.ds(start, size), :],
                sems.at[idx],
            )
            cp.start()
            copies.append(cp)
        for cp in copies:
            cp.wait()

    return kernel


def _pallas_copy_2d(x2d):
    M, N = x2d.shape
    itemsize = jnp.dtype(x2d.dtype).itemsize
    plan = _chunk_plan(M)
    return pl.pallas_call(
        _make_dma_copy_kernel(plan),
        out_shape=jax.ShapeDtypeStruct((M, N), x2d.dtype),
        in_specs=[pl.BlockSpec(memory_space=pl.ANY)],
        out_specs=pl.BlockSpec(memory_space=pl.ANY),
        scratch_shapes=[pltpu.SemaphoreType.DMA((len(plan),))],
        cost_estimate=pl.CostEstimate(
            flops=0,
            transcendentals=0,
            bytes_accessed=2 * M * N * itemsize,
        ),
    )(x2d)


def unsqueeze(x, dim):
    """JAX/Pallas equivalent of torch.unsqueeze(x, dim).

    The data move runs as chunked HBM->HBM async DMAs inside a Pallas kernel;
    the size-1 axis insertion is a metadata-only reshape around the kernel.
    """
    ndim = x.ndim
    # torch.unsqueeze accepts dim in [-ndim-1, ndim]
    if dim < 0:
        dim = dim + ndim + 1
    assert 0 <= dim <= ndim, f"dim {dim} out of range for ndim {ndim}"
    out_shape = x.shape[:dim] + (1,) + x.shape[dim:]

    total = x.size
    if total == 0:
        # Nothing to copy; the unsqueeze is purely metadata.
        return jnp.reshape(x, out_shape)

    last = x.shape[-1] if ndim > 0 else 1
    M, N = _factorize_2d(total, last)
    y2d = _pallas_copy_2d(jnp.reshape(x, (M, N)))
    return jnp.reshape(y2d, out_shape)


if __name__ == "__main__":
    key = jax.random.PRNGKey(0)
    # Small NCHW-style input: batch=2, channels=4, spatial=16x16
    x = jax.random.normal(key, (2, 4, 16, 16), dtype=jnp.float32)

    dim = 1  # module parameter: Unsqueeze(dim=1)
    y = unsqueeze(x, dim)
    y = jax.block_until_ready(y)

    # Verify against reference semantics (jnp.expand_dims == torch.unsqueeze)
    ref = jnp.expand_dims(x, dim)
    assert y.shape == (2, 1, 4, 16, 16), y.shape
    assert y.dtype == x.dtype
    assert jnp.array_equal(y, ref)

    print("KERNEL_OK")
</pallas_src>

<mosaic_0001>
module attributes {stable_mosaic.version = 11 : i64} {
  func.func @kernel(%arg0: memref<8x256xf32, #tpu.memory_space<any>>, %arg1: memref<8x256xf32, #tpu.memory_space<any>>, %arg2: memref<1x!tpu.dma_semaphore, #tpu.memory_space<semaphore_mem>>) attributes {dimension_semantics = [], scalar_prefetch = 0 : i64, scratch_operands = 1 : i64, tpu.core_type = #tpu.core_type<tc>} {
    %c0_i32 = arith.constant 0 : i32
    %c0_i32_0 = arith.constant 0 : i32
    %c0_i32_1 = arith.constant 0 : i32
    %0 = tpu.memref_slice %arg0[%c0_i32_0, %c0_i32_1] : memref<8x256xf32, #tpu.memory_space<any>> -> memref<8x256xf32, #tpu.memory_space<any>>
    %c0_i32_2 = arith.constant 0 : i32
    %c0_i32_3 = arith.constant 0 : i32
    %1 = tpu.memref_slice %arg1[%c0_i32_2, %c0_i32_3] : memref<8x256xf32, #tpu.memory_space<any>> -> memref<8x256xf32, #tpu.memory_space<any>>
    %2 = tpu.memref_slice %arg2[%c0_i32] : memref<1x!tpu.dma_semaphore, #tpu.memory_space<semaphore_mem>> -> memref<1x!tpu.dma_semaphore, #tpu.memory_space<semaphore_mem>>
    %3 = tpu.memref_squeeze %2 : memref<1x!tpu.dma_semaphore, #tpu.memory_space<semaphore_mem>> -> memref<!tpu.dma_semaphore, #tpu.memory_space<semaphore_mem>>
    tpu.enqueue_dma source(%0 : memref<8x256xf32, #tpu.memory_space<any>>) target(%1 : memref<8x256xf32, #tpu.memory_space<any>>) target_semaphore(%3 : memref<!tpu.dma_semaphore, #tpu.memory_space<semaphore_mem>>)
    %c0_i32_4 = arith.constant 0 : i32
    %c0_i32_5 = arith.constant 0 : i32
    %c0_i32_6 = arith.constant 0 : i32
    %4 = tpu.memref_slice %arg0[%c0_i32_5, %c0_i32_6] : memref<8x256xf32, #tpu.memory_space<any>> -> memref<8x256xf32, #tpu.memory_space<any>>
    %c0_i32_7 = arith.constant 0 : i32
    %c0_i32_8 = arith.constant 0 : i32
    %5 = tpu.memref_slice %arg1[%c0_i32_7, %c0_i32_8] : memref<8x256xf32, #tpu.memory_space<any>> -> memref<8x256xf32, #tpu.memory_space<any>>
    %6 = tpu.memref_slice %arg2[%c0_i32_4] : memref<1x!tpu.dma_semaphore, #tpu.memory_space<semaphore_mem>> -> memref<1x!tpu.dma_semaphore, #tpu.memory_space<semaphore_mem>>
    %7 = tpu.memref_squeeze %6 : memref<1x!tpu.dma_semaphore, #tpu.memory_space<semaphore_mem>> -> memref<!tpu.dma_semaphore, #tpu.memory_space<semaphore_mem>>
    tpu.wait_dma2 semaphore(%7 : memref<!tpu.dma_semaphore, #tpu.memory_space<semaphore_mem>>) src(%4 : memref<8x256xf32, #tpu.memory_space<any>>) dst(%5 : memref<8x256xf32, #tpu.memory_space<any>>)
    return
  }
}

</mosaic_0001>

<bundles_post_ra>
// kernel: tpu_custom_call.1
= control target key start
LH: loop header
LB: loop body
LE: loop exit
PB: predicated region body
PF: predicated region fallthrough
CT: control target
= control target key end

     0   :  { %s29_s6 = smov [#allocation2]   ;;  %s30_s7 = smov 131072   ;;  %s48_s0 = inlined_call_operand.hbm [shape: f32[8,256], index: 0, kind: input, shape index: {}]   ;;  %s49_s1 = inlined_call_operand.hbm [shape: f32[8,256], index: 1, kind: output, shape index: {}]  }
   0x1   :  { %s31_s8 = smov 0  }
   0x2   :  { %12 = dma.general %s48_s0, 256, %s49_s1, %s29_s6, %s30_s7, [#allocation4], %s31_s8, 0  }
   0x3   :  { %27 = dma.done.wait [#allocation2], 256 }
   0x4   :  { %28 = vsyncadd [#allocation2], 4294967040 }
   0x5   :  { %17 = vsyncmov [#allocation2] }
   0x8   :  { %s18_s13 = vpop.sfrf %17 }
   0x9   :  { %p23_p0 = scmp.ne.s32.totalorder %s18_s13, 0 }
   0xb   :  { %22 = shalt.err (%p23_p0)  }

</bundles_post_ra>
